<compile_context>
chip_gen: v5e
topology: v5e:2x2
jax: 0.10.0
libtpu: 0.0.40
codegen_flags: <defaults>
</compile_context>

<pallas_src>
import math

import jax
import jax.numpy as jnp
from jax.experimental import pallas as pl
from jax.experimental.pallas import tpu as pltpu


def rnn_relu_kernel(x_ref, h0_ref, wih_t_ref, whh_t_ref, b_ref, out_ref, hn_ref):
    B, T, F = x_ref.shape
    Hd = whh_t_ref.shape[1]

    # ---- Phase 1 (parallel over time): batched input projection -------------
    # (B*T, F) @ (F, Hd) + fused bias -> pre-activations for every timestep.
    # One MXU matmul instead of T tiny ones; result kept in registers.
    x2d = x_ref[...].reshape(B * T, F)
    pre = jnp.dot(x2d, wih_t_ref[...], preferred_element_type=jnp.float32) + b_ref[...]
    pre = pre.reshape(B, T, Hd)

    # ---- Phase 2 (serial recurrence): h_t = relu(pre_t + h_{t-1} @ W_hh^T) ---
    # T is a small compile-time constant, so the loop is fully unrolled at trace
    # time (equivalent to lax.fori_loop(..., unroll=True)); h stays in vregs and
    # the only per-step VMEM traffic is the single store of h_t.
    whh_t = whh_t_ref[...]
    h = h0_ref[...]
    for t in range(T):
        h = jnp.maximum(
            pre[:, t]
            + jnp.dot(h, whh_t, preferred_element_type=jnp.float32),
            0.0)
        out_ref[:, t, :] = h
    hn_ref[...] = h                      # final hidden state, written once


def rnn_forward(X, H, w_ih, w_hh, b_ih, b_hh):
    """X: (B, T, F) batch_first, H: (1, B, Hd).

    Returns (output (B, T, Hd), h_n (1, B, Hd)) matching torch.nn.RNN
    (single layer, relu nonlinearity, batch_first) semantics.
    """
    B, T, F = X.shape
    Hd = w_ih.shape[0]

    x = X.astype(jnp.float32)                                 # (B, T, F), no transpose
    h0 = H[0].astype(jnp.float32)                             # (B, Hd)
    wih_t = jnp.transpose(w_ih).astype(jnp.float32)           # (F, Hd)  pre-transposed once
    whh_t = jnp.transpose(w_hh).astype(jnp.float32)           # (Hd, Hd) pre-transposed once
    bias = (b_ih + b_hh).reshape(1, Hd).astype(jnp.float32)   # fused bias

    def vmem():
        return pl.BlockSpec(memory_space=pltpu.MemorySpace.VMEM)

    # Everything (X, weights, outputs) fits trivially in VMEM at these sizes,
    # so a single grid-less invocation with whole-array blocks is used.
    # TODO(synk): for long sequences / large batches, chunk T with a grid
    #             (hidden state in VMEM scratch) and shard the batch across cores.
    out, h_n = pl.pallas_call(
        rnn_relu_kernel,
        out_shape=(jax.ShapeDtypeStruct((B, T, Hd), jnp.float32),
                   jax.ShapeDtypeStruct((B, Hd), jnp.float32)),
        in_specs=[vmem() for _ in range(5)],
        out_specs=(vmem(), vmem()),
    )(x, h0, wih_t, whh_t, bias)

    return out, h_n[None]                                     # (B,T,Hd), (1,B,Hd)


def rnn_reference(X, H, w_ih, w_hh, b_ih, b_hh):
    """Pure-JAX reference matching torch.nn.RNN(relu, batch_first, 1 layer)."""
    B, T, F = X.shape
    h = H[0]
    outs = []
    for t in range(T):
        h = jnp.maximum(X[:, t] @ w_ih.T + b_ih + h @ w_hh.T + b_hh, 0.0)
        outs.append(h)
    return jnp.stack(outs, axis=1), h[None]


if __name__ == "__main__":
    # Shapes implied by the module: input_size=3, hidden_size=3, num_layers=1.
    B, T, F, Hd = 2, 8, 3, 3

    key = jax.random.PRNGKey(0)
    kx, k1, k2, k3, k4 = jax.random.split(key, 5)

    # torch.nn.RNN-style init: U(-1/sqrt(hidden), 1/sqrt(hidden)).
    bound = 1.0 / math.sqrt(Hd)
    w_ih = jax.random.uniform(k1, (Hd, F), jnp.float32, -bound, bound)
    w_hh = jax.random.uniform(k2, (Hd, Hd), jnp.float32, -bound, bound)
    b_ih = jax.random.uniform(k3, (Hd,), jnp.float32, -bound, bound)
    b_hh = jax.random.uniform(k4, (Hd,), jnp.float32, -bound, bound)

    X = jax.random.normal(kx, (B, T, F), jnp.float32)
    H = jnp.zeros((1, B, Hd), jnp.float32)   # get_zero_hidden equivalent

    out, h_n = rnn_forward(X, H, w_ih, w_hh, b_ih, b_hh)
    out = jax.block_until_ready(out)
    h_n = jax.block_until_ready(h_n)

    ref_out, ref_hn = rnn_reference(X, H, w_ih, w_hh, b_ih, b_hh)

    assert out.shape == (B, T, Hd) and h_n.shape == (1, B, Hd)
    assert jnp.allclose(out, ref_out, rtol=1e-5, atol=1e-5), "output mismatch"
    assert jnp.allclose(h_n, ref_hn, rtol=1e-5, atol=1e-5), "h_n mismatch"

    print("KERNEL_OK")
</pallas_src>

<mosaic_0001>
module attributes {stable_mosaic.version = 11 : i64} {
  func.func @rnn_relu_kernel(%arg0: memref<2x8x3xf32, #tpu.memory_space<vmem>>, %arg1: memref<2x3xf32, #tpu.memory_space<vmem>>, %arg2: memref<3x3xf32, #tpu.memory_space<vmem>>, %arg3: memref<3x3xf32, #tpu.memory_space<vmem>>, %arg4: memref<1x3xf32, #tpu.memory_space<vmem>>, %arg5: memref<2x8x3xf32, #tpu.memory_space<vmem>>, %arg6: memref<2x3xf32, #tpu.memory_space<vmem>>) attributes {dimension_semantics = [], scalar_prefetch = 0 : i64, scratch_operands = 0 : i64, tpu.core_type = #tpu.core_type<tc>} {
    %c0 = arith.constant 0 : index
    %c0_0 = arith.constant 0 : index
    %c0_1 = arith.constant 0 : index
    %0 = vector.load %arg0[%c0, %c0_0, %c0_1] : memref<2x8x3xf32, #tpu.memory_space<vmem>>, vector<2x8x3xf32>
    %1 = vector.shape_cast %0 : vector<2x8x3xf32> to vector<16x3xf32>
    %c0_2 = arith.constant 0 : index
    %c0_3 = arith.constant 0 : index
    %2 = vector.load %arg2[%c0_2, %c0_3] : memref<3x3xf32, #tpu.memory_space<vmem>>, vector<3x3xf32>
    %cst = arith.constant dense<0.000000e+00> : vector<16x3xf32>
    %3 = tpu.matmul %1, %2, %cst {dimension_numbers = #tpu.dot_dimension_numbers<[1], [0], [0], [1], [0, 0, 1, 1], [], []>} : vector<16x3xf32>, vector<3x3xf32>, vector<16x3xf32> -> vector<16x3xf32>
    %c0_4 = arith.constant 0 : index
    %c0_5 = arith.constant 0 : index
    %4 = vector.load %arg4[%c0_4, %c0_5] : memref<1x3xf32, #tpu.memory_space<vmem>>, vector<1x3xf32>
    %5 = vector.broadcast %4 : vector<1x3xf32> to vector<16x3xf32>
    %6 = arith.addf %3, %5 : vector<16x3xf32>
    %7 = vector.shape_cast %6 : vector<16x3xf32> to vector<2x8x3xf32>
    %c0_6 = arith.constant 0 : index
    %c0_7 = arith.constant 0 : index
    %8 = vector.load %arg3[%c0_6, %c0_7] : memref<3x3xf32, #tpu.memory_space<vmem>>, vector<3x3xf32>
    %c0_8 = arith.constant 0 : index
    %c0_9 = arith.constant 0 : index
    %9 = vector.load %arg1[%c0_8, %c0_9] : memref<2x3xf32, #tpu.memory_space<vmem>>, vector<2x3xf32>
    %10 = vector.extract_strided_slice %7 {offsets = [0, 0, 0], sizes = [2, 1, 3], strides = [1, 1, 1]} : vector<2x8x3xf32> to vector<2x1x3xf32>
    %11 = vector.shape_cast %10 : vector<2x1x3xf32> to vector<2x3xf32>
    %cst_10 = arith.constant dense<0.000000e+00> : vector<2x3xf32>
    %12 = tpu.matmul %9, %8, %cst_10 {dimension_numbers = #tpu.dot_dimension_numbers<[1], [0], [0], [1], [0, 0, 1, 1], [], []>} : vector<2x3xf32>, vector<3x3xf32>, vector<2x3xf32> -> vector<2x3xf32>
    %13 = arith.addf %11, %12 : vector<2x3xf32>
    %cst_11 = arith.constant 0.000000e+00 : f32
    %14 = vector.broadcast %cst_11 : f32 to vector<2x3xf32>
    %15 = arith.maximumf %13, %14 : vector<2x3xf32>
    %c0_12 = arith.constant 0 : index
    %c0_13 = arith.constant 0 : index
    %c0_14 = arith.constant 0 : index
    %16 = vector.load %arg5[%c0_12, %c0_13, %c0_14] : memref<2x8x3xf32, #tpu.memory_space<vmem>>, vector<2x1x3xf32>
    %17 = vector.shape_cast %16 : vector<2x1x3xf32> to vector<2x3xf32>
    %18 = vector.shape_cast %15 : vector<2x3xf32> to vector<2x1x3xf32>
    tpu.vector_store %arg5[%c0_12, %c0_13, %c0_14], %18 {strides = array<i32>} : memref<2x8x3xf32, #tpu.memory_space<vmem>>, vector<2x1x3xf32>,
    %19 = vector.extract_strided_slice %7 {offsets = [0, 1, 0], sizes = [2, 1, 3], strides = [1, 1, 1]} : vector<2x8x3xf32> to vector<2x1x3xf32>
    %20 = vector.shape_cast %19 : vector<2x1x3xf32> to vector<2x3xf32>
    %cst_15 = arith.constant dense<0.000000e+00> : vector<2x3xf32>
    %21 = tpu.matmul %15, %8, %cst_15 {dimension_numbers = #tpu.dot_dimension_numbers<[1], [0], [0], [1], [0, 0, 1, 1], [], []>} : vector<2x3xf32>, vector<3x3xf32>, vector<2x3xf32> -> vector<2x3xf32>
    %22 = arith.addf %20, %21 : vector<2x3xf32>
    %cst_16 = arith.constant 0.000000e+00 : f32
    %23 = vector.broadcast %cst_16 : f32 to vector<2x3xf32>
    %24 = arith.maximumf %22, %23 : vector<2x3xf32>
    %c0_17 = arith.constant 0 : index
    %c1 = arith.constant 1 : index
    %c0_18 = arith.constant 0 : index
    %25 = vector.load %arg5[%c0_17, %c1, %c0_18] : memref<2x8x3xf32, #tpu.memory_space<vmem>>, vector<2x1x3xf32>
    %26 = vector.shape_cast %25 : vector<2x1x3xf32> to vector<2x3xf32>
    %27 = vector.shape_cast %24 : vector<2x3xf32> to vector<2x1x3xf32>
    tpu.vector_store %arg5[%c0_17, %c1, %c0_18], %27 {strides = array<i32>} : memref<2x8x3xf32, #tpu.memory_space<vmem>>, vector<2x1x3xf32>,
    %28 = vector.extract_strided_slice %7 {offsets = [0, 2, 0], sizes = [2, 1, 3], strides = [1, 1, 1]} : vector<2x8x3xf32> to vector<2x1x3xf32>
    %29 = vector.shape_cast %28 : vector<2x1x3xf32> to vector<2x3xf32>
    %cst_19 = arith.constant dense<0.000000e+00> : vector<2x3xf32>
    %30 = tpu.matmul %24, %8, %cst_19 {dimension_numbers = #tpu.dot_dimension_numbers<[1], [0], [0], [1], [0, 0, 1, 1], [], []>} : vector<2x3xf32>, vector<3x3xf32>, vector<2x3xf32> -> vector<2x3xf32>
    %31 = arith.addf %29, %30 : vector<2x3xf32>
    %cst_20 = arith.constant 0.000000e+00 : f32
    %32 = vector.broadcast %cst_20 : f32 to vector<2x3xf32>
    %33 = arith.maximumf %31, %32 : vector<2x3xf32>
    %c0_21 = arith.constant 0 : index
    %c2 = arith.constant 2 : index
    %c0_22 = arith.constant 0 : index
    %34 = vector.load %arg5[%c0_21, %c2, %c0_22] : memref<2x8x3xf32, #tpu.memory_space<vmem>>, vector<2x1x3xf32>
    %35 = vector.shape_cast %34 : vector<2x1x3xf32> to vector<2x3xf32>
    %36 = vector.shape_cast %33 : vector<2x3xf32> to vector<2x1x3xf32>
    tpu.vector_store %arg5[%c0_21, %c2, %c0_22], %36 {strides = array<i32>} : memref<2x8x3xf32, #tpu.memory_space<vmem>>, vector<2x1x3xf32>,
    %37 = vector.extract_strided_slice %7 {offsets = [0, 3, 0], sizes = [2, 1, 3], strides = [1, 1, 1]} : vector<2x8x3xf32> to vector<2x1x3xf32>
    %38 = vector.shape_cast %37 : vector<2x1x3xf32> to vector<2x3xf32>
    %cst_23 = arith.constant dense<0.000000e+00> : vector<2x3xf32>
    %39 = tpu.matmul %33, %8, %cst_23 {dimension_numbers = #tpu.dot_dimension_numbers<[1], [0], [0], [1], [0, 0, 1, 1], [], []>} : vector<2x3xf32>, vector<3x3xf32>, vector<2x3xf32> -> vector<2x3xf32>
    %40 = arith.addf %38, %39 : vector<2x3xf32>
    %cst_24 = arith.constant 0.000000e+00 : f32
    %41 = vector.broadcast %cst_24 : f32 to vector<2x3xf32>
    %42 = arith.maximumf %40, %41 : vector<2x3xf32>
    %c0_25 = arith.constant 0 : index
    %c3 = arith.constant 3 : index
    %c0_26 = arith.constant 0 : index
    %43 = vector.load %arg5[%c0_25, %c3, %c0_26] : memref<2x8x3xf32, #tpu.memory_space<vmem>>, vector<2x1x3xf32>
    %44 = vector.shape_cast %43 : vector<2x1x3xf32> to vector<2x3xf32>
    %45 = vector.shape_cast %42 : vector<2x3xf32> to vector<2x1x3xf32>
    tpu.vector_store %arg5[%c0_25, %c3, %c0_26], %45 {strides = array<i32>} : memref<2x8x3xf32, #tpu.memory_space<vmem>>, vector<2x1x3xf32>,
    %46 = vector.extract_strided_slice %7 {offsets = [0, 4, 0], sizes = [2, 1, 3], strides = [1, 1, 1]} : vector<2x8x3xf32> to vector<2x1x3xf32>
    %47 = vector.shape_cast %46 : vector<2x1x3xf32> to vector<2x3xf32>
    %cst_27 = arith.constant dense<0.000000e+00> : vector<2x3xf32>
    %48 = tpu.matmul %42, %8, %cst_27 {dimension_numbers = #tpu.dot_dimension_numbers<[1], [0], [0], [1], [0, 0, 1, 1], [], []>} : vector<2x3xf32>, vector<3x3xf32>, vector<2x3xf32> -> vector<2x3xf32>
    %49 = arith.addf %47, %48 : vector<2x3xf32>
    %cst_28 = arith.constant 0.000000e+00 : f32
    %50 = vector.broadcast %cst_28 : f32 to vector<2x3xf32>
    %51 = arith.maximumf %49, %50 : vector<2x3xf32>
    %c0_29 = arith.constant 0 : index
    %c4 = arith.constant 4 : index
    %c0_30 = arith.constant 0 : index
    %52 = vector.load %arg5[%c0_29, %c4, %c0_30] : memref<2x8x3xf32, #tpu.memory_space<vmem>>, vector<2x1x3xf32>
    %53 = vector.shape_cast %52 : vector<2x1x3xf32> to vector<2x3xf32>
    %54 = vector.shape_cast %51 : vector<2x3xf32> to vector<2x1x3xf32>
    tpu.vector_store %arg5[%c0_29, %c4, %c0_30], %54 {strides = array<i32>} : memref<2x8x3xf32, #tpu.memory_space<vmem>>, vector<2x1x3xf32>,
    %55 = vector.extract_strided_slice %7 {offsets = [0, 5, 0], sizes = [2, 1, 3], strides = [1, 1, 1]} : vector<2x8x3xf32> to vector<2x1x3xf32>
    %56 = vector.shape_cast %55 : vector<2x1x3xf32> to vector<2x3xf32>
    %cst_31 = arith.constant dense<0.000000e+00> : vector<2x3xf32>
    %57 = tpu.matmul %51, %8, %cst_31 {dimension_numbers = #tpu.dot_dimension_numbers<[1], [0], [0], [1], [0, 0, 1, 1], [], []>} : vector<2x3xf32>, vector<3x3xf32>, vector<2x3xf32> -> vector<2x3xf32>
    %58 = arith.addf %56, %57 : vector<2x3xf32>
    %cst_32 = arith.constant 0.000000e+00 : f32
    %59 = vector.broadcast %cst_32 : f32 to vector<2x3xf32>
    %60 = arith.maximumf %58, %59 : vector<2x3xf32>
    %c0_33 = arith.constant 0 : index
    %c5 = arith.constant 5 : index
    %c0_34 = arith.constant 0 : index
    %61 = vector.load %arg5[%c0_33, %c5, %c0_34] : memref<2x8x3xf32, #tpu.memory_space<vmem>>, vector<2x1x3xf32>
    %62 = vector.shape_cast %61 : vector<2x1x3xf32> to vector<2x3xf32>
    %63 = vector.shape_cast %60 : vector<2x3xf32> to vector<2x1x3xf32>
    tpu.vector_store %arg5[%c0_33, %c5, %c0_34], %63 {strides = array<i32>} : memref<2x8x3xf32, #tpu.memory_space<vmem>>, vector<2x1x3xf32>,
    %64 = vector.extract_strided_slice %7 {offsets = [0, 6, 0], sizes = [2, 1, 3], strides = [1, 1, 1]} : vector<2x8x3xf32> to vector<2x1x3xf32>
    %65 = vector.shape_cast %64 : vector<2x1x3xf32> to vector<2x3xf32>
    %cst_35 = arith.constant dense<0.000000e+00> : vector<2x3xf32>
    %66 = tpu.matmul %60, %8, %cst_35 {dimension_numbers = #tpu.dot_dimension_numbers<[1], [0], [0], [1], [0, 0, 1, 1], [], []>} : vector<2x3xf32>, vector<3x3xf32>, vector<2x3xf32> -> vector<2x3xf32>
    %67 = arith.addf %65, %66 : vector<2x3xf32>
    %cst_36 = arith.constant 0.000000e+00 : f32
    %68 = vector.broadcast %cst_36 : f32 to vector<2x3xf32>
    %69 = arith.maximumf %67, %68 : vector<2x3xf32>
    %c0_37 = arith.constant 0 : index
    %c6 = arith.constant 6 : index
    %c0_38 = arith.constant 0 : index
    %70 = vector.load %arg5[%c0_37, %c6, %c0_38] : memref<2x8x3xf32, #tpu.memory_space<vmem>>, vector<2x1x3xf32>
    %71 = vector.shape_cast %70 : vector<2x1x3xf32> to vector<2x3xf32>
    %72 = vector.shape_cast %69 : vector<2x3xf32> to vector<2x1x3xf32>
    tpu.vector_store %arg5[%c0_37, %c6, %c0_38], %72 {strides = array<i32>} : memref<2x8x3xf32, #tpu.memory_space<vmem>>, vector<2x1x3xf32>,
    %73 = vector.extract_strided_slice %7 {offsets = [0, 7, 0], sizes = [2, 1, 3], strides = [1, 1, 1]} : vector<2x8x3xf32> to vector<2x1x3xf32>
    %74 = vector.shape_cast %73 : vector<2x1x3xf32> to vector<2x3xf32>
    %cst_39 = arith.constant dense<0.000000e+00> : vector<2x3xf32>
    %75 = tpu.matmul %69, %8, %cst_39 {dimension_numbers = #tpu.dot_dimension_numbers<[1], [0], [0], [1], [0, 0, 1, 1], [], []>} : vector<2x3xf32>, vector<3x3xf32>, vector<2x3xf32> -> vector<2x3xf32>
    %76 = arith.addf %74, %75 : vector<2x3xf32>
    %cst_40 = arith.constant 0.000000e+00 : f32
    %77 = vector.broadcast %cst_40 : f32 to vector<2x3xf32>
    %78 = arith.maximumf %76, %77 : vector<2x3xf32>
    %c0_41 = arith.constant 0 : index
    %c7 = arith.constant 7 : index
    %c0_42 = arith.constant 0 : index
    %79 = vector.load %arg5[%c0_41, %c7, %c0_42] : memref<2x8x3xf32, #tpu.memory_space<vmem>>, vector<2x1x3xf32>
    %80 = vector.shape_cast %79 : vector<2x1x3xf32> to vector<2x3xf32>
    %81 = vector.shape_cast %78 : vector<2x3xf32> to vector<2x1x3xf32>
    tpu.vector_store %arg5[%c0_41, %c7, %c0_42], %81 {strides = array<i32>} : memref<2x8x3xf32, #tpu.memory_space<vmem>>, vector<2x1x3xf32>,
    %c0_43 = arith.constant 0 : index
    %c0_44 = arith.constant 0 : index
    %82 = vector.load %arg6[%c0_43, %c0_44] : memref<2x3xf32, #tpu.memory_space<vmem>>, vector<2x3xf32>
    tpu.vector_store %arg6[%c0_43, %c0_44], %78 {strides = array<i32>} : memref<2x3xf32, #tpu.memory_space<vmem>>, vector<2x3xf32>,
    return
  }
}

</mosaic_0001>

<bundles_post_ra>
// kernel: tpu_custom_call.1
= control target key start
LH: loop header
LB: loop body
LE: loop exit
PB: predicated region body
PF: predicated region fallthrough
CT: control target
= control target key end

     0   :  { %vm37_vm0 = vcmask 1042432   ;;  %vm30_vm1 = vcmask 23552   ;;  %s602_s0 = inlined_call_operand.vmem [shape: f32[2,8,3], index: 0, kind: input, shape index: {}]   ;;  %s603_s1 = inlined_call_operand.vmem [shape: f32[2,3], index: 1, kind: input, shape index: {}]   ;;  %s604_s2 = inlined_call_operand.vmem [shape: f32[3,3], index: 2, kind: input, shape index: {}]   ;;  %s605_s3 = inlined_call_operand.vmem [shape: f32[3,3], index: 3, kind: input, shape index: {}]   ;;  %s606_s4 = inlined_call_operand.vmem [shape: f32[1,3], index: 4, kind: input, shape index: {}]   ;;  %s607_s5 = inlined_call_operand.vmem [shape: f32[2,8,3], index: 5, kind: output, shape index: {0}]   ;;  %s608_s6 = inlined_call_operand.hbm [shape: f32[2,3], index: 6, kind: output, shape index: {1}]  }
   0x1   :  { %v25_v0 = vld [vmem:[%s604_s2] sm:$0x7] }
   0x2   :  { %v23_v1 = vld [vmem:[%s602_s0] sm:$0xff]  ;;  %401 = vmatpush.msk.msra.mxu0 %vm37_vm0, %v25_v0 }
   0x3   :  { %v64_v2 = vld [vmem:[%s605_s3] sm:$0x7]  ;;  %402 = vmatmul.msk.f32.vlgmr.msra.gmra.mxu0 %vm30_vm1, %v23_v1 }
   0x4   :  { %v65_v3 = vld [vmem:[%s603_s1] sm:$0x3]  ;;  %404 = vmatpush.msk.msra.mxu1 %vm37_vm0, %v64_v2 }
   0x5   :  { %12 = vsyncpa [#allocation3], 0  ;;  %405 = vmatmul.msk.f32.vlgmr.msra.gmra.mxu1 %vm30_vm1, %v65_v3  ;;  %406 = vmatpush.msk.msra.mxu2 %vm37_vm0, %v64_v2  ;;  %v24_v4 = vld [vmem:[%s602_s0 + $0x8] sm:$0xff]  ;;  %v421_v5 = vld [vmem:[%s606_s4] ss:$0 sm:$0xff]  ;;  %vm100_vm2 = vcmask 16384  }
   0x6   :  { %408 = vmatpush.msk.msra.mxu3 %vm37_vm0, %v64_v2  ;;  %410 = vmatpush.msk.msrb.mxu1 %vm37_vm0, %v64_v2  ;;  %vm106_vm3 = vcmask 1041409   ;;  %vm138_vm4 = vcmask 17409   ;;  %vm176_vm5 = vcmask 18434   ;;  %vm215_vm6 = vcmask 19459   ;;  %s448_s29 = smov [#allocation2]   ;;  %s390_s4 = sshll.u32 %s608_s6, 4  ;;  %s391_s4 = int_to_ptr.hbm [resolvable:$true] %s390_s4 }
   0x7   :  { %412 = vmatpush.msk.msrb.mxu2 %vm37_vm0, %v64_v2  ;;  %416 = vmatpush.msk.msrb.mxu0 %vm37_vm0, %v64_v2  ;;  %vm254_vm7 = vcmask 20484   ;;  %vm293_vm8 = vcmask 21509   ;;  %vm332_vm9 = vcmask 22534   ;;  %vm371_vm10 = vcmask 23559   ;;  %s388_s30 = sshll.u32 %s448_s29, 4  ;;  %s389_s30 = int_to_ptr.vmem [resolvable:$true] %s388_s30 }
   0x8   :  { %414 = vmatpush.msk.msrb.mxu3 %vm37_vm0, %v64_v2  ;;  %418 = vmatpush.msk.msra.mxu1 %vm37_vm0, %v64_v2 }
   0xb   :  { %403 = vmatmul.msk.f32.gmra.mxu0 %vm30_vm1, %v24_v4 }
  0x80   :  { %v58_v6 = vpop.f32.mrf.mxu0 }
  0x81   :  { %v514_v7 = vadd.f32 %v421_v5, %v58_v6 }
  0x82   :  { %v89_v8 = vpop.f32.mrf.mxu1 }
  0x83   :  { %v96_v9 = vadd.f32 %v89_v8, %v514_v7  ;;  %v93_v11 = vrot.slane %v89_v8, 1 }
  0x85   :  { %v98_v10 = vmax.f32 %v96_v9, 0.0 }
  0x87   :  { %101 = vst.msk [vmem:[%s607_s5] sm:$0x1] %vm100_vm2, %v98_v10 }
  0x88   :  { %v61_v12 = vpop.f32.mrf.mxu0 }
  0x89   :  { %v521_v13 = vadd.f32 %v421_v5, %v61_v12 }
  0x8b   :  { %v97_v14 = vadd.f32 %v93_v11, %v521_v13 }
  0x8d   :  { %v99_v15 = vmax.f32 %v97_v14, 0.0 }
  0x8f   :  { %102 = vst.msk [vmem:[%s607_s5 + $0x8] sm:$0x1] %vm100_vm2, %v99_v15  ;;  %v105_v16 = vrot.slane %v99_v15, 7 }
  0x91   :  { %v107_v17 = vsel %vm106_vm3, %v105_v16, %v98_v10 }
  0x92   :  { %407 = vmatmul.msk.f32.vlgmr.msra.gmra.mxu2 %vm30_vm1, %v107_v17 }
 0x115   :  { %v127_v18 = vpop.f32.mrf.mxu2 }
 0x116   :  { %v131_v19 = vrot.slane %v127_v18, 7  ;;  %v135_v20 = vadd.f32 %v127_v18, %v521_v13 }
 0x118   :  { %v134_v21 = vadd.f32 %v131_v19, %v514_v7  ;;  %v137_v22 = vmax.f32 %v135_v20, 0.0 }
 0x11a   :  { %v136_v23 = vmax.f32 %v134_v21, 0.0  ;;  %140 = vst.msk [vmem:[%s607_s5 + $0x8] sm:$0x2] %vm138_vm4, %v137_v22 }
 0x11c   :  { %139 = vst.msk [vmem:[%s607_s5] sm:$0x2] %vm138_vm4, %v136_v23  ;;  %v143_v24 = vrot.slane %v136_v23, 1 }
 0x11e   :  { %v144_v25 = vsel %vm106_vm3, %v137_v22, %v143_v24 }
 0x11f   :  { %409 = vmatmul.msk.f32.vlgmr.msra.gmra.mxu3 %vm30_vm1, %v144_v25 }
 0x1a2   :  { %v164_v26 = vpop.f32.mrf.mxu3 }
 0x1a3   :  { %v168_v27 = vrot.slane %v164_v26, 6  ;;  %v169_v28 = vrot.slane %v164_v26, 7 }
 0x1a5   :  { %v172_v29 = vadd.f32 %v168_v27, %v514_v7  ;;  %v173_v30 = vadd.f32 %v169_v28, %v521_v13 }
 0x1a7   :  { %v174_v31 = vmax.f32 %v172_v29, 0.0  ;;  %v175_v32 = vmax.f32 %v173_v30, 0.0 }
 0x1a9   :  { %177 = vst.msk [vmem:[%s607_s5] sm:$0x4] %vm176_vm5, %v174_v31  ;;  %v181_v33 = vrot.slane %v174_v31, 2  ;;  %v182_v34 = vrot.slane %v175_v32, 1 }
 0x1aa   :  { %178 = vst.msk [vmem:[%s607_s5 + $0x8] sm:$0x4] %vm176_vm5, %v175_v32 }
 0x1ab   :  { %v183_v35 = vsel %vm106_vm3, %v182_v34, %v181_v33 }
 0x1ac   :  { %411 = vmatmul.msk.f32.vlgmr.msrb.gmra.mxu1 %vm30_vm1, %v183_v35 }
 0x229   :  { %v203_v36 = vpop.f32.mrf.mxu1 }
 0x22a   :  { %v207_v37 = vrot.slane %v203_v36, 5  ;;  %v208_v38 = vrot.slane %v203_v36, 6 }
 0x22c   :  { %v211_v39 = vadd.f32 %v207_v37, %v514_v7  ;;  %v212_v40 = vadd.f32 %v208_v38, %v521_v13 }
 0x22e   :  { %v213_v41 = vmax.f32 %v211_v39, 0.0  ;;  %v214_v42 = vmax.f32 %v212_v40, 0.0 }
 0x230   :  { %216 = vst.msk [vmem:[%s607_s5] sm:$0x8] %vm215_vm6, %v213_v41  ;;  %v220_v43 = vrot.slane %v213_v41, 3  ;;  %v221_v44 = vrot.slane %v214_v42, 2 }
 0x231   :  { %217 = vst.msk [vmem:[%s607_s5 + $0x8] sm:$0x8] %vm215_vm6, %v214_v42 }
 0x232   :  { %v222_v45 = vsel %vm106_vm3, %v221_v44, %v220_v43 }
 0x233   :  { %413 = vmatmul.msk.f32.vlgmr.msrb.gmra.mxu2 %vm30_vm1, %v222_v45 }
 0x2b6   :  { %v242_v46 = vpop.f32.mrf.mxu2 }
 0x2b7   :  { %v246_v47 = vrot.slane %v242_v46, 4  ;;  %v247_v48 = vrot.slane %v242_v46, 5 }
 0x2b9   :  { %v250_v49 = vadd.f32 %v246_v47, %v514_v7  ;;  %v251_v50 = vadd.f32 %v247_v48, %v521_v13 }
 0x2bb   :  { %v252_v51 = vmax.f32 %v250_v49, 0.0  ;;  %v253_v52 = vmax.f32 %v251_v50, 0.0 }
 0x2bd   :  { %255 = vst.msk [vmem:[%s607_s5] sm:$0x10] %vm254_vm7, %v252_v51  ;;  %v259_v53 = vrot.slane %v252_v51, 4  ;;  %v260_v54 = vrot.slane %v253_v52, 3 }
 0x2be   :  { %256 = vst.msk [vmem:[%s607_s5 + $0x8] sm:$0x10] %vm254_vm7, %v253_v52 }
 0x2bf   :  { %v261_v55 = vsel %vm106_vm3, %v260_v54, %v259_v53 }
 0x2c0   :  { %415 = vmatmul.msk.f32.vlgmr.msrb.gmra.mxu3 %vm30_vm1, %v261_v55 }
 0x343   :  { %v281_v56 = vpop.f32.mrf.mxu3 }
 0x344   :  { %v285_v57 = vrot.slane %v281_v56, 3  ;;  %v286_v58 = vrot.slane %v281_v56, 4 }
 0x346   :  { %v289_v59 = vadd.f32 %v285_v57, %v514_v7  ;;  %v290_v60 = vadd.f32 %v286_v58, %v521_v13 }
 0x348   :  { %v291_v61 = vmax.f32 %v289_v59, 0.0  ;;  %v292_v62 = vmax.f32 %v290_v60, 0.0 }
 0x34a   :  { %294 = vst.msk [vmem:[%s607_s5] sm:$0x20] %vm293_vm8, %v291_v61  ;;  %v298_v63 = vrot.slane %v291_v61, 5  ;;  %v299_v0 = vrot.slane %v292_v62, 4 }
 0x34b   :  { %295 = vst.msk [vmem:[%s607_s5 + $0x8] sm:$0x20] %vm293_vm8, %v292_v62 }
 0x34c   :  { %v300_v1 = vsel %vm106_vm3, %v299_v0, %v298_v63 }
 0x34d   :  { %417 = vmatmul.msk.f32.vlgmr.msrb.gmra.mxu0 %vm30_vm1, %v300_v1 }
 0x3ca   :  { %v320_v2 = vpop.f32.mrf.mxu0 }
 0x3cb   :  { %v324_v3 = vrot.slane %v320_v2, 2  ;;  %v325_v4 = vrot.slane %v320_v2, 3 }
 0x3cd   :  { %v328_v5 = vadd.f32 %v324_v3, %v514_v7  ;;  %v329_v6 = vadd.f32 %v325_v4, %v521_v13 }
 0x3cf   :  { %v330_v8 = vmax.f32 %v328_v5, 0.0  ;;  %v331_v9 = vmax.f32 %v329_v6, 0.0 }
 0x3d1   :  { %333 = vst.msk [vmem:[%s607_s5] sm:$0x40] %vm332_vm9, %v330_v8  ;;  %v337_v10 = vrot.slane %v330_v8, 6  ;;  %v338_v11 = vrot.slane %v331_v9, 5 }
 0x3d2   :  { %334 = vst.msk [vmem:[%s607_s5 + $0x8] sm:$0x40] %vm332_vm9, %v331_v9 }
 0x3d3   :  { %v339_v12 = vsel %vm106_vm3, %v338_v11, %v337_v10 }
 0x3d4   :  { %419 = vmatmul.msk.f32.vlgmr.msra.gmra.mxu1 %vm30_vm1, %v339_v12 }
 0x451   :  { %v359_v14 = vpop.f32.mrf.mxu1 }
 0x452   :  { %v363_v15 = vrot.slane %v359_v14, 1  ;;  %v364_v16 = vrot.slane %v359_v14, 2 }
 0x454   :  { %v367_v17 = vadd.f32 %v363_v15, %v514_v7  ;;  %v368_v18 = vadd.f32 %v364_v16, %v521_v13 }
 0x456   :  { %v369_v19 = vmax.f32 %v367_v17, 0.0  ;;  %v370_v20 = vmax.f32 %v368_v18, 0.0 }
 0x458   :  { %372 = vst.msk [vmem:[%s607_s5] sm:$0x80] %vm371_vm10, %v369_v19  ;;  %v376_v21 = vrot.slane %v370_v20, 7 }
 0x459   :  { %373 = vst.msk [vmem:[%s607_s5 + $0x8] sm:$0x80] %vm371_vm10, %v370_v20 }
 0x45a   :  { %379 = vst.msk [vmem:[#allocation2 - $0x7] sm:$0x80] %vm371_vm10, %v369_v19 }
 0x45b   :  { %380 = vst.msk [vmem:[#allocation2 + $0x1] sm:$0x1] %vm100_vm2, %v376_v21 }
 0x45c   :  { %393 = dma.vmem_to_hbm [thread:$0]  %s389_s30, 32, %s391_s4, [#allocation3]  }
 0x45d   :  { %446 = dma.done.wait [#allocation3], 32  }
 0x45e   :  { %447 = vsyncadd [#allocation3], 4294967264 }
 0x45f   :  { %400 = vsyncpa [#allocation3], 1 }

</bundles_post_ra>
